<compile_context>
chip_gen: v7x
topology: tpu7x:2x2x1
jax: 0.10.0
libtpu: 0.0.40
codegen_flags: <defaults>
</compile_context>

<pallas_src>
import math

import jax
import jax.numpy as jnp
from jax.experimental import pallas as pl
from jax.experimental.pallas import tpu as pltpu

LEAKY_SLOPE = 0.01   # PyTorch F.leaky_relu default negative_slope
SUBLANE = 8


def _round_up(n, m):
    return ((n + m - 1) // m) * m


def _num_tensorcores():
    """Best-effort TensorCore count per chip (v7x has 2; v5e/v6e have 1)."""
    try:
        kind = (getattr(jax.devices()[0], "device_kind", "") or "").lower()
        if "v7" in kind or "7x" in kind:
            return 2
    except Exception:
        pass
    return 1


def _vmem_limit_bytes():
    try:
        cap = int(pltpu.get_tpu_info().vmem_capacity_bytes)
    except Exception:
        cap = 64 << 20           # conservative (v7x-sized) fallback
    return int(cap * 3 // 4)     # ~96 MiB on v5e/v6e, ~48 MiB on v7x


def _spn_kernel(x_ref, w1_ref, b1_ref, w2_ref, b2_ref, w3_ref, b3_ref, o_ref):
    """Fused MLP: lrelu(x@W1+b1) -> lrelu(.@W2+b2) -> (.@W3+b3) -> sin(.)*pi."""
    x = x_ref[...].astype(w1_ref.dtype)            # cast in VMEM (no extra HBM pass)

    h = jnp.dot(x, w1_ref[...], preferred_element_type=jnp.float32) + b1_ref[...]
    h = jnp.maximum(h, LEAKY_SLOPE * h)            # leaky_relu, single VPU max

    h = jnp.dot(h.astype(w2_ref.dtype), w2_ref[...],
                preferred_element_type=jnp.float32) + b2_ref[...]
    h = jnp.maximum(h, LEAKY_SLOPE * h)

    h = jnp.dot(h.astype(w3_ref.dtype), w3_ref[...],
                preferred_element_type=jnp.float32) + b3_ref[...]
    o_ref[...] = (jnp.sin(h) * jnp.float32(math.pi)).astype(o_ref.dtype)


def semantic_pointer_network_sin_forward(x, params, *, block_b=None,
                                         compute_dtype=jnp.bfloat16):
    """Forward pass of SemanticPointerNetworkSin.

    x: [B, num_features] (any float dtype; streamed as-is, cast inside the kernel).
    params: weights stored [in, out] (transposed vs. PyTorch) and biases [1, out].
    compute_dtype: dtype of the weight matrices / MXU inputs (bf16 default; pass
      jnp.float32 for exact f32 parity).  Accumulation is always f32.
    Returns [B, dims] float32 (no padding, no post-kernel slice).
    """
    B, F = x.shape
    w1, b1 = params["w1"], params["b1"]
    w2, b2 = params["w2"], params["b2"]
    w3, b3 = params["w3"], params["b3"]
    H = w1.shape[1]
    D = w3.shape[1]
    assert w1.shape == (F, H) and w2.shape == (H, H) and w3.shape == (H, D)

    comp_bytes = jnp.dtype(compute_dtype).itemsize
    x_bytes = jnp.dtype(x.dtype).itemsize

    # Weights are cast once (tiny, resident in VMEM); biases stay f32 (added after
    # the f32 accumulate).
    w1_c = w1.astype(compute_dtype)
    w2_c = w2.astype(compute_dtype)
    w3_c = w3.astype(compute_dtype)
    b1_c = b1.astype(jnp.float32)
    b2_c = b2.astype(jnp.float32)
    b3_c = b3.astype(jnp.float32)

    vmem_limit = _vmem_limit_bytes()
    weight_bytes = comp_bytes * (F * H + H * H + H * D) + 4 * (2 * H + D)
    # TODO(synk): for production F/H past ~2048 on v7x (64 MiB VMEM), single-buffer
    # the weight specs or add a K-reduction grid axis instead of keeping all three
    # weight matrices resident.

    # ---- batch-tile selection -------------------------------------------------
    if block_b is None:
        # per-row VMEM: double-buffered x/out tiles + in-kernel activation temps
        bytes_per_row = (2 * F * x_bytes + 2 * D * 4
                         + comp_bytes * (F + H) + 4 * (2 * H + D))
        budget = vmem_limit - 2 * weight_bytes - (2 << 20)   # 2x-buffered weights + slack
        budget = max(budget, SUBLANE * bytes_per_row)
        bb = (budget // bytes_per_row) // SUBLANE * SUBLANE
        bb = max(SUBLANE, min(bb, 4096))
        # Split across TensorCores only when the part actually has 2 of them (v7x)
        # and each core still gets >= 512-row tiles (v5e/v6e are single-TC: the
        # grid is a serial loop, so keep the biggest tile the VMEM budget allows).
        if _num_tensorcores() >= 2 and B >= 2 * 512:
            half = _round_up((B + 1) // 2, SUBLANE)
            bb = min(bb, max(512, half))
        block_b = bb
    if block_b >= B:
        block_b = B                                           # single full-extent tile
    else:
        block_b = max(SUBLANE, (block_b // SUBLANE) * SUBLANE)

    grid = (pl.cdiv(B, block_b),)

    cost = pl.CostEstimate(
        flops=2 * B * (F * H + H * H + H * D),
        transcendentals=B * D,
        bytes_accessed=x_bytes * B * F + 4 * B * D + weight_bytes,
    )

    # NOTE: if profiling shows exposed x-stream DMA at large block_b, add
    # pipeline_mode=pl.Buffered(3) to the x BlockSpec.
    out = pl.pallas_call(
        _spn_kernel,
        out_shape=jax.ShapeDtypeStruct((B, D), jnp.float32),
        grid=grid,
        in_specs=[
            pl.BlockSpec((block_b, F), lambda i: (i, 0)),   # x tile (streamed)
            pl.BlockSpec((F, H), lambda i: (0, 0)),         # W1 (resident)
            pl.BlockSpec((1, H), lambda i: (0, 0)),         # b1
            pl.BlockSpec((H, H), lambda i: (0, 0)),         # W2
            pl.BlockSpec((1, H), lambda i: (0, 0)),         # b2
            pl.BlockSpec((H, D), lambda i: (0, 0)),         # W3 (olayer)
            pl.BlockSpec((1, D), lambda i: (0, 0)),         # b3
        ],
        out_specs=pl.BlockSpec((block_b, D), lambda i: (i, 0)),
        compiler_params=pltpu.CompilerParams(
            dimension_semantics=("parallel",),
            vmem_limit_bytes=vmem_limit,
        ),
        cost_estimate=cost,
    )(x, w1_c, b1_c, w2_c, b2_c, w3_c, b3_c)

    return out


def init_params(key, num_features, h_size, dims):
    """nn.Linear-style init: U(-1/sqrt(fan_in), 1/sqrt(fan_in)).
    Weights stored [in, out] (transposed vs. PyTorch's [out, in])."""
    ks = jax.random.split(key, 6)

    def linear(kw, kb, fan_in, fan_out):
        bound = 1.0 / math.sqrt(fan_in)
        w = jax.random.uniform(kw, (fan_in, fan_out), jnp.float32, -bound, bound)
        b = jax.random.uniform(kb, (1, fan_out), jnp.float32, -bound, bound)
        return w, b

    w1, b1 = linear(ks[0], ks[1], num_features, h_size)
    w2, b2 = linear(ks[2], ks[3], h_size, h_size)        # MUL_FACTOR = 1
    w3, b3 = linear(ks[4], ks[5], h_size, dims)          # olayer
    return {"w1": w1, "b1": b1, "w2": w2, "b2": b2, "w3": w3, "b3": b3}


def _reference_forward(x, params):
    """Pure-JAX reference (true-f32 matmuls) for sanity checking."""
    hp = jax.lax.Precision.HIGHEST

    def lrelu(v):
        return jnp.where(v >= 0, v, LEAKY_SLOPE * v)

    h = lrelu(jnp.dot(x, params["w1"], precision=hp) + params["b1"])
    h = lrelu(jnp.dot(h, params["w2"], precision=hp) + params["b2"])
    h = jnp.dot(h, params["w3"], precision=hp) + params["b3"]
    return jnp.sin(h) * jnp.float32(math.pi)


# TODO(synk): only forward() is kernelized; create_label_embedding / inference /
# circular_inference (circular convolution, approximate inverse, FAISS lookup)
# are outside the forward spec and not translated.

if __name__ == "__main__":
    batch, num_features, h_size, dims = 8, 32, 32, 16

    key = jax.random.PRNGKey(0)
    k_x, k_p = jax.random.split(key)
    x = jax.random.normal(k_x, (batch, num_features), dtype=jnp.float32)
    params = init_params(k_p, num_features, h_size, dims)

    ref = jax.block_until_ready(_reference_forward(x, params))

    # Exact-parity path (f32 weights / MXU inputs, f32 accumulation).
    out_f32 = jax.block_until_ready(
        semantic_pointer_network_sin_forward(x, params, compute_dtype=jnp.float32))
    assert out_f32.shape == (batch, dims)
    assert bool(jnp.allclose(out_f32, ref, atol=1e-3, rtol=1e-3)), "f32 path mismatch"

    # Default path (bf16 weights / MXU inputs, f32 accumulation) — looser tolerance.
    out_bf16 = jax.block_until_ready(semantic_pointer_network_sin_forward(x, params))
    assert out_bf16.shape == (batch, dims)
    assert bool(jnp.allclose(out_bf16, ref, atol=1e-1)), "bf16 path mismatch"

    print("KERNEL_OK")
</pallas_src>

<mosaic_0001>
module attributes {stable_mosaic.version = 11 : i64} {
  func.func @_spn_kernel(%arg0: i32, %arg1: memref<8x32xf32, #tpu.memory_space<vmem>>, %arg2: memref<32x32xf32, #tpu.memory_space<vmem>>, %arg3: memref<1x32xf32, #tpu.memory_space<vmem>>, %arg4: memref<32x32xf32, #tpu.memory_space<vmem>>, %arg5: memref<1x32xf32, #tpu.memory_space<vmem>>, %arg6: memref<32x16xf32, #tpu.memory_space<vmem>>, %arg7: memref<1x16xf32, #tpu.memory_space<vmem>>, %arg8: memref<8x16xf32, #tpu.memory_space<vmem>>) attributes {dimension_semantics = [#tpu.dimension_semantics<parallel>], iteration_bounds = array<i64: 1>, scalar_prefetch = 0 : i64, scratch_operands = 0 : i64, tpu.core_type = #tpu.core_type<tc>, window_params = [{transform_indices = @transform_0, window_bounds = array<i64: 8, 32>}, {pipeline_mode = #tpu.pipeline_mode<synchronous>, transform_indices = @transform_1, window_bounds = array<i64: 32, 32>}, {pipeline_mode = #tpu.pipeline_mode<synchronous>, transform_indices = @transform_2, window_bounds = array<i64: 1, 32>}, {pipeline_mode = #tpu.pipeline_mode<synchronous>, transform_indices = @transform_3, window_bounds = array<i64: 32, 32>}, {pipeline_mode = #tpu.pipeline_mode<synchronous>, transform_indices = @transform_4, window_bounds = array<i64: 1, 32>}, {pipeline_mode = #tpu.pipeline_mode<synchronous>, transform_indices = @transform_5, window_bounds = array<i64: 32, 16>}, {pipeline_mode = #tpu.pipeline_mode<synchronous>, transform_indices = @transform_6, window_bounds = array<i64: 1, 16>}, {transform_indices = @transform_7, window_bounds = array<i64: 8, 16>}]} {
    %c0 = arith.constant 0 : index
    %c0_0 = arith.constant 0 : index
    %0 = vector.load %arg1[%c0, %c0_0] : memref<8x32xf32, #tpu.memory_space<vmem>>, vector<8x32xf32>
    %c0_1 = arith.constant 0 : index
    %c0_2 = arith.constant 0 : index
    %1 = vector.load %arg2[%c0_1, %c0_2] : memref<32x32xf32, #tpu.memory_space<vmem>>, vector<32x32xf32>
    %cst = arith.constant dense<0.000000e+00> : vector<8x32xf32>
    %2 = tpu.matmul %0, %1, %cst {dimension_numbers = #tpu.dot_dimension_numbers<[1], [0], [0], [1], [0, 0, 1, 1], [], []>} : vector<8x32xf32>, vector<32x32xf32>, vector<8x32xf32> -> vector<8x32xf32>
    %c0_3 = arith.constant 0 : index
    %c0_4 = arith.constant 0 : index
    %3 = vector.load %arg3[%c0_3, %c0_4] : memref<1x32xf32, #tpu.memory_space<vmem>>, vector<1x32xf32>
    %4 = vector.broadcast %3 : vector<1x32xf32> to vector<8x32xf32>
    %5 = arith.addf %2, %4 : vector<8x32xf32>
    %cst_5 = arith.constant 0.00999999977 : f32
    %6 = vector.broadcast %cst_5 : f32 to vector<8x32xf32>
    %7 = arith.mulf %6, %5 : vector<8x32xf32>
    %8 = arith.maximumf %5, %7 : vector<8x32xf32>
    %c0_6 = arith.constant 0 : index
    %c0_7 = arith.constant 0 : index
    %9 = vector.load %arg4[%c0_6, %c0_7] : memref<32x32xf32, #tpu.memory_space<vmem>>, vector<32x32xf32>
    %cst_8 = arith.constant dense<0.000000e+00> : vector<8x32xf32>
    %10 = tpu.matmul %8, %9, %cst_8 {dimension_numbers = #tpu.dot_dimension_numbers<[1], [0], [0], [1], [0, 0, 1, 1], [], []>} : vector<8x32xf32>, vector<32x32xf32>, vector<8x32xf32> -> vector<8x32xf32>
    %c0_9 = arith.constant 0 : index
    %c0_10 = arith.constant 0 : index
    %11 = vector.load %arg5[%c0_9, %c0_10] : memref<1x32xf32, #tpu.memory_space<vmem>>, vector<1x32xf32>
    %12 = vector.broadcast %11 : vector<1x32xf32> to vector<8x32xf32>
    %13 = arith.addf %10, %12 : vector<8x32xf32>
    %cst_11 = arith.constant 0.00999999977 : f32
    %14 = vector.broadcast %cst_11 : f32 to vector<8x32xf32>
    %15 = arith.mulf %14, %13 : vector<8x32xf32>
    %16 = arith.maximumf %13, %15 : vector<8x32xf32>
    %c0_12 = arith.constant 0 : index
    %c0_13 = arith.constant 0 : index
    %17 = vector.load %arg6[%c0_12, %c0_13] : memref<32x16xf32, #tpu.memory_space<vmem>>, vector<32x16xf32>
    %cst_14 = arith.constant dense<0.000000e+00> : vector<8x16xf32>
    %18 = tpu.matmul %16, %17, %cst_14 {dimension_numbers = #tpu.dot_dimension_numbers<[1], [0], [0], [1], [0, 0, 1, 1], [], []>} : vector<8x32xf32>, vector<32x16xf32>, vector<8x16xf32> -> vector<8x16xf32>
    %c0_15 = arith.constant 0 : index
    %c0_16 = arith.constant 0 : index
    %19 = vector.load %arg7[%c0_15, %c0_16] : memref<1x16xf32, #tpu.memory_space<vmem>>, vector<1x16xf32>
    %20 = vector.broadcast %19 : vector<1x16xf32> to vector<8x16xf32>
    %21 = arith.addf %18, %20 : vector<8x16xf32>
    %22 = math.sin %21 : vector<8x16xf32>
    %cst_17 = arith.constant 3.14159274 : f32
    %23 = vector.broadcast %cst_17 : f32 to vector<8x16xf32>
    %24 = arith.mulf %22, %23 : vector<8x16xf32>
    %c0_18 = arith.constant 0 : index
    %c0_19 = arith.constant 0 : index
    %25 = vector.load %arg8[%c0_18, %c0_19] : memref<8x16xf32, #tpu.memory_space<vmem>>, vector<8x16xf32>
    tpu.vector_store %arg8[%c0_18, %c0_19], %24 {strides = array<i32>} : memref<8x16xf32, #tpu.memory_space<vmem>>, vector<8x16xf32>,
    return
  }
  func.func @transform_0(%arg0: i32) -> (i32, i32) {
    %c0_i32 = arith.constant 0 : i32
    %c0_i32_0 = arith.constant 0 : i32
    return %arg0, %c0_i32 : i32, i32
  }
  func.func @transform_1(%arg0: i32) -> (i32, i32) {
    %c0_i32 = arith.constant 0 : i32
    %c0_i32_0 = arith.constant 0 : i32
    %c0_i32_1 = arith.constant 0 : i32
    return %c0_i32, %c0_i32_0 : i32, i32
  }
  func.func @transform_2(%arg0: i32) -> (i32, i32) {
    %c0_i32 = arith.constant 0 : i32
    %c0_i32_0 = arith.constant 0 : i32
    %c0_i32_1 = arith.constant 0 : i32
    return %c0_i32, %c0_i32_0 : i32, i32
  }
  func.func @transform_3(%arg0: i32) -> (i32, i32) {
    %c0_i32 = arith.constant 0 : i32
    %c0_i32_0 = arith.constant 0 : i32
    %c0_i32_1 = arith.constant 0 : i32
    return %c0_i32, %c0_i32_0 : i32, i32
  }
  func.func @transform_4(%arg0: i32) -> (i32, i32) {
    %c0_i32 = arith.constant 0 : i32
    %c0_i32_0 = arith.constant 0 : i32
    %c0_i32_1 = arith.constant 0 : i32
    return %c0_i32, %c0_i32_0 : i32, i32
  }
  func.func @transform_5(%arg0: i32) -> (i32, i32) {
    %c0_i32 = arith.constant 0 : i32
    %c0_i32_0 = arith.constant 0 : i32
    %c0_i32_1 = arith.constant 0 : i32
    return %c0_i32, %c0_i32_0 : i32, i32
  }
  func.func @transform_6(%arg0: i32) -> (i32, i32) {
    %c0_i32 = arith.constant 0 : i32
    %c0_i32_0 = arith.constant 0 : i32
    %c0_i32_1 = arith.constant 0 : i32
    return %c0_i32, %c0_i32_0 : i32, i32
  }
  func.func @transform_7(%arg0: i32) -> (i32, i32) {
    %c0_i32 = arith.constant 0 : i32
    %c0_i32_0 = arith.constant 0 : i32
    return %arg0, %c0_i32 : i32, i32
  }
}

</mosaic_0001>

<bundles_post_ra>
// kernel: tpu_custom_call.1
= control target key start
LH: loop header
LB: loop body
LE: loop exit
PB: predicated region body
PF: predicated region fallthrough
CT: control target
= control target key end

     0   :  { %12 = vsyncpa [#allocation3], 0  ;;  %s706_s0 = inlined_call_operand.vmem [shape: f32[8,32], index: 0, kind: input, shape index: {}]   ;;  %s707_s1 = inlined_call_operand.vmem [shape: f32[32,32], index: 1, kind: input, shape index: {}]   ;;  %s708_s2 = inlined_call_operand.vmem [shape: f32[1,32], index: 2, kind: input, shape index: {}]   ;;  %s709_s3 = inlined_call_operand.hbm [shape: f32[32,32], index: 3, kind: input, shape index: {}]   ;;  %s710_s4 = inlined_call_operand.vmem [shape: f32[1,32], index: 4, kind: input, shape index: {}]   ;;  %s711_s5 = inlined_call_operand.vmem [shape: f32[32,16], index: 5, kind: input, shape index: {}]   ;;  %s712_s6 = inlined_call_operand.vmem [shape: f32[1,16], index: 6, kind: input, shape index: {}]   ;;  %s713_s7 = inlined_call_operand.hbm [shape: f32[8,16], index: 7, kind: output, shape index: {}]  }
   0x1   :  { %13 = vsyncpa [#allocation4], 0  ;;  %s566_s24 = smov [#allocation2]   ;;  %s518_s28 = scalar_lea.hbm %s709_s3, 512 }
   0x2   :  { %s25_s25 = sshll.u32 %s566_s24, 4  ;;  %p519_p0 = scmp.ne.s32.totalorder %s709_s3, %s518_s28  ;;  %s26_s25 = int_to_ptr.vmem [resolvable:$true] %s25_s25 }
   0x3   :  { %p522_p1 = scmp.lt.u32.totalorder %s518_s28, %s709_s3 }
   0x5   :  { %p524_p2 = pnand %p522_p1, %p519_p0 }
   0x7   :  { %527 = shalt.err (!%p524_p2)
}
   0x8   :  { %s528_s10 = scalar_lea.vmem %s26_s25, 512  ;;  %p533_p4 = scmp.lt.s32.totalorder %s26_s25, %s26_s25 }
   0x9   :  { %p529_p3 = scmp.ne.s32.totalorder %s26_s25, %s528_s10  ;;  %p534_p5 = scmp.lt.s32.totalorder %s528_s10, %s528_s10 }
   0xb   :  { %p535_p6 = por %p534_p5, %p533_p4 }
   0xd   :  { %p536_p7 = pnand %p535_p6, %p529_p3 }
   0xf   :  { %539 = shalt.err (!%p536_p7)
}
  0x10   :  { %s567_s11 = smov 128   ;;  %s568_s12 = smov 8  }
  0x11   :  { %31 = dma.hbm_to_vmem [thread:$0]  %s709_s3, 512, %s26_s25, [#allocation3], %s567_s11, %s567_s11, %s568_s12  }
  0x12   :  { %562 = dma.done.wait [#allocation3], 512  }
  0x13   :  { %563 = vsyncadd [#allocation3], 4294966784  ;;  %v569_v0 = vmov 0.0|0.0   ;;  %vm570_vm0 = vmmov 0   ;;  %v571_v1 = vmov 0.0   ;;  %v42_v2 = vld [vmem:[%s707_s1] sm:$0xff] }
  0x14   :  { %479 = vmatprep.subr.bf16.mxu0 %v569_v0  ;;  %454 = vmatprep.mubr.msk.f32.mxu0 %vm570_vm0, %v571_v1  ;;  %v43_v3 = vld [vmem:[%s707_s1 + $0x8] sm:$0xff]  ;;  %v44_v4 = vld [vmem:[%s707_s1 + $0x10] sm:$0xff]  ;;  %v45_v6 = vld [vmem:[%s707_s1 + $0x18] sm:$0xff]  ;;  %vm53_vm1 = vcmask 261120   ;;  %v572_v47 = vmov 683565275  }
  0x15   :  { %485 = vmatprep.subr.bf16.mxu1 %v569_v0  ;;  %465 = vmatprep.mubr.msk.f32.mxu1 %vm570_vm0, %v571_v1  ;;  %v480_v5 = vpack.c.bf16 %v43_v3, %v42_v2  ;;  %v483_v7 = vpack.c.bf16 %v45_v6, %v44_v4  ;;  %v41_v8 = vld [vmem:[%s706_s0] sm:$0xff]  ;;  %v130_v10 = vld [vmem:[#allocation2 + $0x8] sm:$0xff]  ;;  %v131_v12 = vld [vmem:[#allocation2 + $0x10] sm:$0xff]  ;;  %v573_v49 = vmov 2475754826   ;;  %vm404_vm15 = vcmask 130048  }
  0x16   :  { %v129_v9 = vld [vmem:[#allocation2] sm:$0xff]  ;;  %v132_v13 = vld [vmem:[#allocation2 + $0x18] sm:$0xff]  ;;  %v216_v22 = vld [vmem:[%s711_s5 + $0x8] sm:$0xff]  ;;  %v574_v52 = vmov 2131351028  }
  0x17   :  { %481 = vmatpush3.bf16.msra.mxu0 %v480_v5  ;;  %v486_v11 = vpack.c.bf16 %v130_v10, %v129_v9  ;;  %v489_v14 = vpack.c.bf16 %v132_v13, %v131_v12  ;;  %v421_v15 = vld [vmem:[%s708_s2] ss:$0 sm:$0xff]  ;;  %v217_v24 = vld [vmem:[%s711_s5 + $0x10] sm:$0xff]  ;;  %v218_v25 = vld [vmem:[%s711_s5 + $0x18] sm:$0xff]  ;;  %v575_v55 = vmov 2102212464  }
  0x18   :  { %482 = vmatprep.subr.bf16.mxu0 %v569_v0  ;;  %v215_v21 = vld [vmem:[%s711_s5] sm:$0xff]  ;;  %v495_v26 = vpack.c.bf16 %v218_v25, %v217_v24  ;;  %v576_v58 = vmov 920167782   ;;  %v577_v61 = vmov 1326507024  }
  0x19   :  { %487 = vmatpush3.bf16.msra.mxu1 %v486_v11  ;;  %v492_v23 = vpack.c.bf16 %v216_v22, %v215_v21  ;;  %v423_v27 = vld [vmem:[%s710_s4] ss:$0 sm:$0xff]  ;;  %s578_s4 = smov [#allocation5]  }
  0x1a   :  { %488 = vmatprep.subr.bf16.mxu1 %v569_v0  ;;  %v425_v33 = vld [vmem:[%s712_s6] ss:$0 sm:$0xff]  ;;  %s412_s5 = sshll.u32 %s578_s4, 4  ;;  %s413_s5 = int_to_ptr.vmem [resolvable:$true] %s412_s5 }
  0x1b   :  { %484 = vmatpush3.bf16.msra.mxu0 %v483_v7  ;;  %s540_s6 = scalar_lea.vmem %s413_s5, 128  ;;  %p545_p9 = scmp.lt.s32.totalorder %s413_s5, %s413_s5 }
  0x1c   :  { %491 = vmatprep.subr.bf16.mxu0 %v569_v0  ;;  %p541_p8 = scmp.ne.s32.totalorder %s413_s5, %s540_s6  ;;  %p546_p10 = scmp.lt.s32.totalorder %s540_s6, %s540_s6 }
  0x1d   :  { %490 = vmatpush3.bf16.msra.mxu1 %v489_v14 }
  0x1e   :  { %455 = vmatmul.mubr.msk.f32.vlgmr.msra.gmra.mrb[0].mxu0 %vm53_vm1, %v41_v8  ;;  %p547_p11 = por %p546_p10, %p545_p9 }
  0x1f   :  { %476 = vmatprep.mubr.msk.f32.mxu0 %vm570_vm0, %v571_v1  ;;  %493 = vmatpush3.bf16.msra.mxu0 %v492_v23 }
  0x20   :  { %494 = vmatprep.subr.bf16.mxu0 %v569_v0  ;;  %p548_p12 = pnand %p547_p11, %p541_p8 }
  0x23   :  { %496 = vmatpush3.bf16.msra.mxu0 %v495_v26 }
  0xf1   :  { %v123_v16 = vpop.f32.mrb[0].mxu0 }
  0xf2   :  { %v124_v17 = vadd.f32 %v421_v15, %v123_v16  ;;  %v456_v18 = vpop.f32.mrb[1].mxu0 }
  0xf4   :  { %v127_v19 = vmul.f32 0.01, %v124_v17 }
  0xf6   :  { %v128_v20 = vmax.f32 %v124_v17, %v127_v19 }
  0xf8   :  { %466 = vmatmul.mubr.msk.f32.vlgmr.msra.gmra.mrb[0].mxu1 %vm53_vm1, %v128_v20 }
 0x1cb   :  { %v209_v28 = vpop.f32.mrb[0].mxu1 }
 0x1cc   :  { %v210_v29 = vadd.f32 %v423_v27, %v209_v28  ;;  %v467_v30 = vpop.f32.mrb[1].mxu1 }
 0x1ce   :  { %v213_v31 = vmul.f32 0.01, %v210_v29 }
 0x1d0   :  { %v214_v32 = vmax.f32 %v210_v29, %v213_v31 }
 0x1d2   :  { %477 = vmatmul.mubr.msk.f32.vlgmr.msra.gmra.mrb[2].mxu0 %vm53_vm1, %v214_v32 }
 0x2a5   :  { %v295_v34 = vpop.f32.mrb[2].mxu0 }
 0x2a6   :  { %v673_v35 = vadd.f32 %v425_v33, %v295_v34  ;;  %v478_v36 = vpop.f32.mrb[3].mxu0 }
 0x2a8   :  { %v302_v37 = vand.u32 2139095040, %v673_v35  ;;  %v299_v41 = vand.u32 2147483647, %v673_v35  ;;  %vm301_vm9 = vcmp.lt.s32.totalorder %v673_v35, 0  ;;  %vm391_vm14 = vweird.f32 %v673_v35 }
 0x2aa   :  { %v303_v38 = vshrl.u32 %v302_v37, 23  ;;  %v306_v44 = vand.u32 8388607, %v299_v41  ;;  %vm300_vm10 = vcmp.le.f32.partialorder %v299_v41, 0.7853982 }
 0x2ac   :  { %v427_v39 = vadd.s32 4294967169, %v303_v38  ;;  %v307_v63 = vor.u32 8388608, %v306_v44 }
 0x2ae   :  { %v309_v40 = vadd.s32 1, %v427_v39  ;;  %v347_v13 = vshll.u32 %v307_v63, 8 }
 0x2b0   :  { %vm310_vm2 = vcmp.gt.s32.totalorder %v309_v40, 0 }
 0x2b1   :  { %v311_v42 = vsel %vm310_vm2, %v309_v40, 0 }
 0x2b2   :  { %v313_v43 = vand.u32 31, %v311_v42  ;;  %v312_v46 = vshrl.u32 %v311_v42, 5 }
 0x2b4   :  { %v314_v45 = vsub.s32 32, %v313_v43  ;;  %v316_v48 = vshll.u32 %v572_v47, %v313_v43  ;;  %v319_v50 = vshll.u32 %v573_v49, %v313_v43  ;;  %v322_v54 = vshll.u32 %v574_v52, %v313_v43 }
 0x2b5   :  { %v325_v57 = vshll.u32 %v575_v55, %v313_v43  ;;  %v328_v60 = vshll.u32 %v576_v58, %v313_v43  ;;  %vm331_vm3 = vcmp.lt.s32.totalorder %v312_v46, 1  ;;  %vm334_vm4 = vcmp.lt.s32.totalorder %v312_v46, 4 }
 0x2b6   :  { %v317_v51 = vshrl.u32 %v573_v49, %v314_v45  ;;  %v320_v53 = vshrl.u32 %v574_v52, %v314_v45  ;;  %v323_v56 = vshrl.u32 %v575_v55, %v314_v45  ;;  %v326_v59 = vshrl.u32 %v576_v58, %v314_v45 }
 0x2b7   :  { %v329_v62 = vshrl.u32 %v577_v61, %v314_v45  ;;  %v315_v8 = vshrl.u32 %v572_v47, %v314_v45  ;;  %vm333_vm5 = vcmp.lt.s32.totalorder %v312_v46, 3  ;;  %vm332_vm6 = vcmp.lt.s32.totalorder %v312_v46, 2 }
 0x2b8   :  { %v318_v0 = vor.u32 %v317_v51, %v316_v48  ;;  %v321_v1 = vor.u32 %v320_v53, %v319_v50  ;;  %v324_v2 = vor.u32 %v323_v56, %v322_v54  ;;  %v327_v3 = vor.u32 %v326_v59, %v325_v57 }
 0x2b9   :  { %v330_v4 = vor.u32 %v329_v62, %v328_v60 }
 0x2ba   :  { %v336_v5 = vsel %vm334_vm4, %v324_v2, 2102212464  ;;  %v339_v6 = vsel %vm331_vm3, %v318_v0, %v321_v1  ;;  %v343_v7 = vsel %vm331_vm3, %v321_v1, %v324_v2  ;;  %v340_v9 = vsel %vm334_vm4, %v327_v3, 920167782 }
 0x2bb   :  { %v344_v10 = vsel %vm334_vm4, %v330_v4, 1326507024  ;;  %v341_v11 = vsel %vm333_vm5, %v324_v2, %v340_v9  ;;  %v335_v14 = vsel %vm331_vm3, %v315_v8, %v318_v0  ;;  %v337_v15 = vsel %vm333_vm5, %v321_v1, %v336_v5 }
 0x2bc   :  { %v345_v12 = vsel %vm333_vm5, %v327_v3, %v344_v10  ;;  %v342_v16 = vsel %vm332_vm6, %v339_v6, %v341_v11  ;;  %v338_v22 = vsel %vm332_vm6, %v335_v14, %v337_v15 }
 0x2bd   :  { %v346_v17 = vsel %vm332_vm6, %v343_v7, %v345_v12  ;;  %v682_v20 = vmul.u32.u64.low %v347_v13, %v342_v16  ;;  %v683_v21 = vmul.u32.u64.high %v347_v13, %v342_v16, %v682_v20  ;;  %v354_v24 = vmul.u32 %v347_v13, %v338_v22 }
 0x2be   :  { %v679_v18 = vmul.u32.u64.low %v347_v13, %v346_v17  ;;  %v680_v19 = vmul.u32.u64.high %v347_v13, %v346_v17, %v679_v18 }
 0x2bf   :  { %v357_v23 = vadd.s32 1, %v683_v21 }
 0x2c0   :  { %vm356_vm7 = vc.u32 %v680_v19, %v682_v20  ;;  %v355_v37 = vadd.s32 %v682_v20, %v680_v19 }
 0x2c1   :  { %v358_v25 = vsel %vm356_vm7, %v357_v23, %v683_v21 }
 0x2c2   :  { %v359_v26 = vadd.s32 %v358_v25, %v354_v24 }
 0x2c4   :  { %v360_v27 = vadd.s32 536870912, %v359_v26 }
 0x2c6   :  { %v361_v28 = vshrl.u32 %v360_v27, 30 }
 0x2c8   :  { %v362_v29 = vshll.u32 %v361_v28, 30  ;;  %v385_v50 = vsub.s32 4, %v361_v28 }
 0x2ca   :  { %v363_v30 = vsub.s32 %v359_v26, %v362_v29  ;;  %v386_v53 = vsel %vm301_vm9, %v385_v50, %v361_v28 }
 0x2cb   :  { %v388_v55 = vsel %vm300_vm10, 0, %v386_v53 }
 0x2cc   :  { %v365_v31 = vsub.s32 0, %v363_v30  ;;  %v392_v56 = vadd.s32 3, %v388_v55 }
 0x2ce   :  { %v428_v32 = vmin.u32 %v365_v31, %v363_v30  ;;  %v393_v57 = vand.u32 3, %v392_v56 }
 0x2d0   :  { %v367_v33 = vclz %v428_v32  ;;  %vm398_vm11 = vcmp.eq.s32.totalorder %v393_v57, 2  ;;  %vm395_vm12 = vcmp.eq.s32.totalorder %v393_v57, 0  ;;  %vm394_vm13 = vcmp.lt.s32.totalorder %v393_v57, 2 }
 0x2d2   :  { %v429_v34 = vadd.s32 4294967294, %v367_v33 }
 0x2d4   :  { %vm430_vm8 = vcmp.lt.s32.totalorder %v429_v34, 0 }
 0x2d5   :  { %v370_v36 = vsel %vm430_vm8, 0, %v429_v34 }
 0x2d6   :  { %v371_v38 = vsub.s32 32, %v370_v36  ;;  %v375_v39 = vsub.s32 4294967266, %v370_v36  ;;  %v372_v40 = vshll.u32 %v363_v30, %v370_v36 }
 0x2d8   :  { %v373_v42 = vshrl.u32 %v355_v37, %v371_v38  ;;  %v376_v43 = vadd.s32 127, %v375_v39 }
 0x2da   :  { %v374_v44 = vor.u32 %v373_v42, %v372_v40  ;;  %v377_v45 = vshll.u32 %v376_v43, 23 }
 0x2dc   :  { %v378_v46 = vor.u32 4788187, %v377_v45  ;;  %v381_v48 = vcvt.s32.f32 %v374_v44 }
 0x2de   :  { %v379_v47 = vand.u32 2147483647, %v378_v46 }
 0x2e0   :  { %v382_v49 = vmul.f32 %v381_v48, %v379_v47 }
 0x2e2   :  { %v383_v51 = vxor.u32 2147483648, %v382_v49 }
 0x2e4   :  { %v384_v52 = vsel %vm301_vm9, %v383_v51, %v382_v49 }
 0x2e5   :  { %v387_v54 = vsel %vm300_vm10, %v673_v35, %v384_v52 }
 0x2e6   :  { %514 = vcosq.f32 %v387_v54 }
 0x2e7   :  { %516 = vsinq.f32 %v387_v54 }
 0x2f0   :  { %v515_v58 = vpop.eup %514 }
 0x2f1   :  { %v517_v59 = vpop.eup %516  ;;  %v399_v60 = vxor.u32 2147483648, %v515_v58 }
 0x2f2   :  { %v396_v61 = vxor.u32 2147483648, %v517_v59 }
 0x2f3   :  { %v400_v62 = vsel %vm398_vm11, %v399_v60, %v517_v59 }
 0x2f4   :  { %v397_v63 = vsel %vm395_vm12, %v515_v58, %v396_v61 }
 0x2f5   :  { %v401_v41 = vsel %vm394_vm13, %v397_v63, %v400_v62 }
 0x2f6   :  { %v402_v0 = vsel %vm391_vm14, nan, %v401_v41 }
 0x2f7   :  { %v403_v1 = vmul.f32 3.1415927, %v402_v0 }
 0x2f9   :  { %405 = vst.msk [vmem:[#allocation5] sm:$0xff] %vm404_vm15, %v403_v1 }
 0x2fa   :  { %551 = shalt.err (!%p548_p12)
}
 0x2fb   :  { %s552_s14 = scalar_lea.hbm %s713_s7, 128 }
 0x2fc   :  { %p553_p13 = scmp.ne.s32.totalorder %s713_s7, %s552_s14  ;;  %p556_p0 = scmp.lt.u32.totalorder %s552_s14, %s713_s7 }
 0x2fe   :  { %p558_p1 = pnand %p556_p0, %p553_p13 }
 0x300   :  { %561 = shalt.err (!%p558_p1)
}
 0x301   :  { %415 = dma.vmem_to_hbm [thread:$0]  %s413_s5, 128, %s713_s7, [#allocation4]  }
 0x302   :  { %564 = dma.done.wait [#allocation4], 128  }
 0x303   :  { %565 = vsyncadd [#allocation4], 4294967168 }
 0x304   :  { %419 = vsyncpa [#allocation3], 1 }
 0x305   :  { %420 = vsyncpa [#allocation4], 1 }

</bundles_post_ra>
